<compile_context>
chip_gen: v7x
topology: tpu7x:2x2x1
jax: 0.10.0
libtpu: 0.0.40
codegen_flags: <defaults>
</compile_context>

<pallas_src>
import functools

import jax
import jax.numpy as jnp
from jax.experimental import pallas as pl
from jax.experimental.pallas import tpu as pltpu


def _ceil_to(v, m):
    return -(-v // m) * m


def _make_fused_mlp_kernel(num_layers):
    """Fused kernel: y = relu(... relu(relu(x@W1+b1)@W2+b2) ... @Wn+bn).

    Refs arrive as (x, w1, b1, ..., wn, bn, out). Intermediates stay in vregs;
    matmuls accumulate in f32 on the MXU."""

    def kernel(*refs):
        x_ref = refs[0]
        o_ref = refs[-1]
        wb = refs[1:-1]
        h = x_ref[...]
        for i in range(num_layers):
            w_ref = wb[2 * i]
            b_ref = wb[2 * i + 1]
            h = jnp.dot(h.astype(w_ref.dtype), w_ref[...],
                        preferred_element_type=jnp.float32)
            h = jnp.maximum(h + b_ref[...].astype(jnp.float32), 0.0)
            if i < num_layers - 1:
                # Narrow the live inter-layer activation back to the compute
                # dtype (no-op in f32; halves vreg/spill pressure in bf16).
                h = h.astype(w_ref.dtype)
        o_ref[...] = h.astype(o_ref.dtype)

    return kernel


def _vmem_cap_bytes():
    """Generation-aware VMEM budget with headroom for compiler scratch."""
    try:
        info = pltpu.get_tpu_info()
        cap = int(getattr(info, "vmem_capacity_bytes", 64 << 20))
    except Exception:  # not on TPU / query unavailable: assume v7x's 64 MiB
        cap = 64 << 20
    return max(cap - (16 << 20), (cap * 3) // 4)


def _select_batch_tile(B, batch_tile, dtype):
    """Pick the batch tile: big tiles for HBM efficiency, >=2 grid steps when
    the batch is large enough so both v7x TensorCores get work."""
    align = 16 if jnp.dtype(dtype).itemsize <= 2 else 8
    if B <= 4 * align:
        # Tiny batch: one full-extent block (block_shape == array dims is legal
        # even when not (8,128)-aligned).
        return B
    if B > batch_tile:
        return batch_tile
    # Fits in one tile, but split into >=2 grid steps (v7x has 2 TCs).
    tb = _ceil_to(-(-B // 2), align)
    return min(tb, batch_tile)


def _fused_forward(x, params, batch_tile):
    """x: (B, In); params: list of (w_t (in,out), b (1,out))."""
    B, in_f = x.shape
    out_f = params[-1][0].shape[1]
    num_layers = len(params)
    dtype = x.dtype

    tb = _select_batch_tile(B, batch_tile, dtype)
    grid_b = pl.cdiv(B, tb)  # ragged last block: Pallas masks edge stores.

    in_specs = [pl.BlockSpec((tb, in_f), lambda i: (i, 0))]
    flat_inputs = [x]
    for (w_t, b) in params:
        # Whole-array blocks with constant index_map -> weights/biases stay
        # resident in VMEM across all batch tiles.
        in_specs.append(pl.BlockSpec(w_t.shape, lambda i: (0, 0)))
        in_specs.append(pl.BlockSpec(b.shape, lambda i: (0, 0)))
        flat_inputs.extend([w_t, b])

    # TODO(synk): out_f=2 -> masked 2/128-lane stores; write volume is
    # negligible here, only lane-densify if profiling shows exposed epilogue.
    out_specs = pl.BlockSpec((tb, out_f), lambda i: (i, 0))

    itemsize = jnp.dtype(dtype).itemsize
    param_bytes = sum(w.size * w.dtype.itemsize + b.size * b.dtype.itemsize
                      for (w, b) in params)
    tile_bytes = (tb * in_f + tb * out_f) * itemsize
    vmem_bytes = 2 * (param_bytes + tile_bytes) + (2 << 20)
    vmem_bytes = int(min(max(vmem_bytes, 4 << 20), _vmem_cap_bytes()))

    flops = 2 * B * sum(w.shape[0] * w.shape[1] for (w, _) in params)
    bytes_accessed = x.size * itemsize + param_bytes + B * out_f * itemsize

    return pl.pallas_call(
        _make_fused_mlp_kernel(num_layers),
        out_shape=jax.ShapeDtypeStruct((B, out_f), dtype),
        grid=(grid_b,),
        in_specs=in_specs,
        out_specs=out_specs,
        compiler_params=pltpu.CompilerParams(
            dimension_semantics=("parallel",),
            vmem_limit_bytes=vmem_bytes),
        cost_estimate=pl.CostEstimate(flops=flops, transcendentals=0,
                                      bytes_accessed=bytes_accessed),
    )(*flat_inputs)


@functools.partial(jax.jit, static_argnames=("batch_tile",))
def simple_fc_forward(x, params, *, batch_tile=1024):
    """Exact SimpleFCNetwork forward: relu after every layer incl. fc3."""
    return _fused_forward(x, params, batch_tile)


def init_linear_params(key, in_features, out_features, dtype=jnp.float32):
    """nn.Linear-style init (uniform +/- 1/sqrt(in)); stored PRE-TRANSPOSED as
    (in, out) weight and (1, out) bias so the forward path has no per-call
    XLA transpose/reshape."""
    k_w, k_b = jax.random.split(key)
    bound = 1.0 / jnp.sqrt(jnp.asarray(in_features, dtype))
    w = jax.random.uniform(k_w, (out_features, in_features), dtype,
                           minval=-bound, maxval=bound)
    b = jax.random.uniform(k_b, (out_features,), dtype,
                           minval=-bound, maxval=bound)
    return jnp.asarray(w.T), b.reshape(1, -1)


def make_simple_fc_params(key, h_shapes, in_features=392, out_features=2,
                          dtype=jnp.float32):
    """fc1 (392->h0), hidden_l[i] (h_i->h_{i+1}), fc3 (h_last->2)."""
    keys = jax.random.split(key, len(h_shapes) + 1)
    params = [init_linear_params(keys[0], in_features, h_shapes[0], dtype)]
    for i in range(len(h_shapes) - 1):
        params.append(init_linear_params(keys[i + 1], h_shapes[i],
                                         h_shapes[i + 1], dtype))
    params.append(init_linear_params(keys[-1], h_shapes[-1], out_features,
                                     dtype))
    return params


def to_compute_dtype(params, dtype):
    """Cast pre-transposed params for the bf16 fast path (f32 MXU accum)."""
    return [(w.astype(dtype), b.astype(dtype)) for (w, b) in params]


def _reference_forward(x, params):
    out = x
    for w_t, b in params:
        out = jnp.maximum(out @ w_t + b, 0.0)
    return out


if __name__ == "__main__":
    key = jax.random.PRNGKey(0)
    k_x, k_p, k_x2 = jax.random.split(key, 3)

    h_shapes = [64, 32]          # fc1: 392->64, hidden: 64->32, fc3: 32->2
    params = make_simple_fc_params(k_p, h_shapes)

    # Small case (batch=2): single fused kernel invocation, one grid step.
    x = jax.random.normal(k_x, (2, 392), dtype=jnp.float32)
    y = simple_fc_forward(x, params)
    jax.block_until_ready(y)
    ref = _reference_forward(x, params)
    assert y.shape == (2, 2), y.shape
    assert jnp.allclose(y, ref, atol=1e-5, rtol=1e-5), "mismatch (batch=2)"

    # Non-multiple batch: no padding pass — ragged last block plus >=2 grid
    # steps (weights resident in VMEM across tiles, batch axis parallel).
    x2 = jax.random.normal(k_x2, (300, 392), dtype=jnp.float32)
    y2 = simple_fc_forward(x2, params)
    jax.block_until_ready(y2)
    ref2 = _reference_forward(x2, params)
    assert y2.shape == (300, 2), y2.shape
    assert jnp.allclose(y2, ref2, atol=1e-5, rtol=1e-5), "mismatch (batch=300)"

    # Large-batch fast path: bf16 activations/weights, f32 MXU accumulation.
    params_bf16 = to_compute_dtype(params, jnp.bfloat16)
    x3 = x2.astype(jnp.bfloat16)
    y3 = simple_fc_forward(x3, params_bf16)
    jax.block_until_ready(y3)
    assert y3.shape == (300, 2), y3.shape
    assert jnp.allclose(y3.astype(jnp.float32), ref2, atol=0.1, rtol=0.1), \
        "mismatch (bf16 path)"

    print("KERNEL_OK")
</pallas_src>

<mosaic_0001>
module attributes {stable_mosaic.version = 11 : i64} {
  func.func @kernel(%arg0: i32, %arg1: memref<2x392xf32, #tpu.memory_space<vmem>>, %arg2: memref<392x64xf32, #tpu.memory_space<vmem>>, %arg3: memref<1x64xf32, #tpu.memory_space<vmem>>, %arg4: memref<64x32xf32, #tpu.memory_space<vmem>>, %arg5: memref<1x32xf32, #tpu.memory_space<vmem>>, %arg6: memref<32x2xf32, #tpu.memory_space<vmem>>, %arg7: memref<1x2xf32, #tpu.memory_space<vmem>>, %arg8: memref<2x2xf32, #tpu.memory_space<vmem>>) attributes {dimension_semantics = [#tpu.dimension_semantics<parallel>], iteration_bounds = array<i64: 1>, scalar_prefetch = 0 : i64, scratch_operands = 0 : i64, tpu.core_type = #tpu.core_type<tc>, window_params = [{transform_indices = @transform_0, window_bounds = array<i64: 2, 392>}, {pipeline_mode = #tpu.pipeline_mode<synchronous>, transform_indices = @transform_1, window_bounds = array<i64: 392, 64>}, {pipeline_mode = #tpu.pipeline_mode<synchronous>, transform_indices = @transform_2, window_bounds = array<i64: 1, 64>}, {pipeline_mode = #tpu.pipeline_mode<synchronous>, transform_indices = @transform_3, window_bounds = array<i64: 64, 32>}, {pipeline_mode = #tpu.pipeline_mode<synchronous>, transform_indices = @transform_4, window_bounds = array<i64: 1, 32>}, {pipeline_mode = #tpu.pipeline_mode<synchronous>, transform_indices = @transform_5, window_bounds = array<i64: 32, 2>}, {pipeline_mode = #tpu.pipeline_mode<synchronous>, transform_indices = @transform_6, window_bounds = array<i64: 1, 2>}, {transform_indices = @transform_7, window_bounds = array<i64: 2, 2>}]} {
    %c0 = arith.constant 0 : index
    %c0_0 = arith.constant 0 : index
    %0 = vector.load %arg1[%c0, %c0_0] : memref<2x392xf32, #tpu.memory_space<vmem>>, vector<2x392xf32>
    %c0_1 = arith.constant 0 : index
    %c0_2 = arith.constant 0 : index
    %1 = vector.load %arg2[%c0_1, %c0_2] : memref<392x64xf32, #tpu.memory_space<vmem>>, vector<392x64xf32>
    %cst = arith.constant dense<0.000000e+00> : vector<2x64xf32>
    %2 = tpu.matmul %0, %1, %cst {dimension_numbers = #tpu.dot_dimension_numbers<[1], [0], [0], [1], [0, 0, 1, 1], [], []>} : vector<2x392xf32>, vector<392x64xf32>, vector<2x64xf32> -> vector<2x64xf32>
    %c0_3 = arith.constant 0 : index
    %c0_4 = arith.constant 0 : index
    %3 = vector.load %arg3[%c0_3, %c0_4] : memref<1x64xf32, #tpu.memory_space<vmem>>, vector<1x64xf32>
    %4 = vector.broadcast %3 : vector<1x64xf32> to vector<2x64xf32>
    %5 = arith.addf %2, %4 : vector<2x64xf32>
    %cst_5 = arith.constant 0.000000e+00 : f32
    %6 = vector.broadcast %cst_5 : f32 to vector<2x64xf32>
    %7 = arith.maximumf %5, %6 : vector<2x64xf32>
    %c0_6 = arith.constant 0 : index
    %c0_7 = arith.constant 0 : index
    %8 = vector.load %arg4[%c0_6, %c0_7] : memref<64x32xf32, #tpu.memory_space<vmem>>, vector<64x32xf32>
    %cst_8 = arith.constant dense<0.000000e+00> : vector<2x32xf32>
    %9 = tpu.matmul %7, %8, %cst_8 {dimension_numbers = #tpu.dot_dimension_numbers<[1], [0], [0], [1], [0, 0, 1, 1], [], []>} : vector<2x64xf32>, vector<64x32xf32>, vector<2x32xf32> -> vector<2x32xf32>
    %c0_9 = arith.constant 0 : index
    %c0_10 = arith.constant 0 : index
    %10 = vector.load %arg5[%c0_9, %c0_10] : memref<1x32xf32, #tpu.memory_space<vmem>>, vector<1x32xf32>
    %11 = vector.broadcast %10 : vector<1x32xf32> to vector<2x32xf32>
    %12 = arith.addf %9, %11 : vector<2x32xf32>
    %cst_11 = arith.constant 0.000000e+00 : f32
    %13 = vector.broadcast %cst_11 : f32 to vector<2x32xf32>
    %14 = arith.maximumf %12, %13 : vector<2x32xf32>
    %c0_12 = arith.constant 0 : index
    %c0_13 = arith.constant 0 : index
    %15 = vector.load %arg6[%c0_12, %c0_13] : memref<32x2xf32, #tpu.memory_space<vmem>>, vector<32x2xf32>
    %cst_14 = arith.constant dense<0.000000e+00> : vector<2x2xf32>
    %16 = tpu.matmul %14, %15, %cst_14 {dimension_numbers = #tpu.dot_dimension_numbers<[1], [0], [0], [1], [0, 0, 1, 1], [], []>} : vector<2x32xf32>, vector<32x2xf32>, vector<2x2xf32> -> vector<2x2xf32>
    %c0_15 = arith.constant 0 : index
    %c0_16 = arith.constant 0 : index
    %17 = vector.load %arg7[%c0_15, %c0_16] : memref<1x2xf32, #tpu.memory_space<vmem>>, vector<1x2xf32>
    %18 = vector.broadcast %17 : vector<1x2xf32> to vector<2x2xf32>
    %19 = arith.addf %16, %18 : vector<2x2xf32>
    %cst_17 = arith.constant 0.000000e+00 : f32
    %20 = vector.broadcast %cst_17 : f32 to vector<2x2xf32>
    %21 = arith.maximumf %19, %20 : vector<2x2xf32>
    %c0_18 = arith.constant 0 : index
    %c0_19 = arith.constant 0 : index
    %22 = vector.load %arg8[%c0_18, %c0_19] : memref<2x2xf32, #tpu.memory_space<vmem>>, vector<2x2xf32>
    tpu.vector_store %arg8[%c0_18, %c0_19], %21 {strides = array<i32>} : memref<2x2xf32, #tpu.memory_space<vmem>>, vector<2x2xf32>,
    return
  }
  func.func @transform_0(%arg0: i32) -> (i32, i32) {
    %c0_i32 = arith.constant 0 : i32
    %c0_i32_0 = arith.constant 0 : i32
    return %arg0, %c0_i32 : i32, i32
  }
  func.func @transform_1(%arg0: i32) -> (i32, i32) {
    %c0_i32 = arith.constant 0 : i32
    %c0_i32_0 = arith.constant 0 : i32
    %c0_i32_1 = arith.constant 0 : i32
    return %c0_i32, %c0_i32_0 : i32, i32
  }
  func.func @transform_2(%arg0: i32) -> (i32, i32) {
    %c0_i32 = arith.constant 0 : i32
    %c0_i32_0 = arith.constant 0 : i32
    %c0_i32_1 = arith.constant 0 : i32
    return %c0_i32, %c0_i32_0 : i32, i32
  }
  func.func @transform_3(%arg0: i32) -> (i32, i32) {
    %c0_i32 = arith.constant 0 : i32
    %c0_i32_0 = arith.constant 0 : i32
    %c0_i32_1 = arith.constant 0 : i32
    return %c0_i32, %c0_i32_0 : i32, i32
  }
  func.func @transform_4(%arg0: i32) -> (i32, i32) {
    %c0_i32 = arith.constant 0 : i32
    %c0_i32_0 = arith.constant 0 : i32
    %c0_i32_1 = arith.constant 0 : i32
    return %c0_i32, %c0_i32_0 : i32, i32
  }
  func.func @transform_5(%arg0: i32) -> (i32, i32) {
    %c0_i32 = arith.constant 0 : i32
    %c0_i32_0 = arith.constant 0 : i32
    %c0_i32_1 = arith.constant 0 : i32
    return %c0_i32, %c0_i32_0 : i32, i32
  }
  func.func @transform_6(%arg0: i32) -> (i32, i32) {
    %c0_i32 = arith.constant 0 : i32
    %c0_i32_0 = arith.constant 0 : i32
    %c0_i32_1 = arith.constant 0 : i32
    return %c0_i32, %c0_i32_0 : i32, i32
  }
  func.func @transform_7(%arg0: i32) -> (i32, i32) {
    %c0_i32 = arith.constant 0 : i32
    %c0_i32_0 = arith.constant 0 : i32
    return %arg0, %c0_i32 : i32, i32
  }
}

</mosaic_0001>

<bundles_post_ra>
// kernel: simple_fc_forward.1
= control target key start
LH: loop header
LB: loop body
LE: loop exit
PB: predicated region body
PF: predicated region fallthrough
CT: control target
= control target key end

     0   :  { %v630_v5 = vmov 0.0|0.0   ;;  %v631_v22 = vmov 1983009808   ;;  %v89_v24 = vlaneseq  ;;  %s897_s0 = inlined_call_operand.vmem [shape: f32[2,392], index: 0, kind: input, shape index: {}]   ;;  %s898_s1 = inlined_call_operand.vmem [shape: f32[392,64], index: 1, kind: input, shape index: {}]   ;;  %s899_s2 = inlined_call_operand.vmem [shape: f32[1,64], index: 2, kind: input, shape index: {}]   ;;  %s900_s3 = inlined_call_operand.vmem [shape: f32[64,32], index: 3, kind: input, shape index: {}]   ;;  %s901_s4 = inlined_call_operand.vmem [shape: f32[1,32], index: 4, kind: input, shape index: {}]   ;;  %s902_s5 = inlined_call_operand.vmem [shape: f32[32,2], index: 5, kind: input, shape index: {}]   ;;  %s903_s6 = inlined_call_operand.vmem [shape: f32[1,2], index: 6, kind: input, shape index: {}]   ;;  %s904_s7 = inlined_call_operand.hbm [shape: f32[2,2], index: 7, kind: output, shape index: {}]  }
   0x1   :  { %v44_v0 = vld [vmem:[%s898_s1 + $0x80] sm:$0xff]  ;;  %v45_v1 = vld [vmem:[%s898_s1 + $0x88] sm:$0xff]  ;;  %558 = vmatprep.subr.bf16.mxu1 %v630_v5  ;;  %v46_v10 = vld [vmem:[%s898_s1 + $0x90] sm:$0xff]  ;;  %v87_v23 = vunpack.c.l.s4 %v631_v22 }
   0x2   :  { %v28_v2 = vld [vmem:[%s898_s1] sm:$0xff]  ;;  %v526_v3 = vpack.c.bf16 %v45_v1, %v44_v0  ;;  %v29_v4 = vld [vmem:[%s898_s1 + $0x8] sm:$0xff]  ;;  %v47_v11 = vld [vmem:[%s898_s1 + $0x98] sm:$0xff]  ;;  %v90_v35 = vshrl.u32 %v89_v24, 7 }
   0x3   :  { %v60_v6 = vld [vmem:[%s898_s1 + $0x100] sm:$0xff]  ;;  %v61_v7 = vld [vmem:[%s898_s1 + $0x108] sm:$0xff]  ;;  %v528_v8 = vpack.c.bf16 %v29_v4, %v28_v2  ;;  %v30_v12 = vld [vmem:[%s898_s1 + $0x10] sm:$0xff]  ;;  %v530_v13 = vpack.c.bf16 %v47_v11, %v46_v10  ;;  %v88_v34 = vunpack.c.0.s8 %v87_v23 }
   0x4   :  { %v559_v9 = vpack.c.bf16 %v61_v7, %v60_v6  ;;  %527 = vmatprep.subr.bf16.mxu0 %v526_v3  ;;  %v31_v14 = vld [vmem:[%s898_s1 + $0x18] sm:$0xff]  ;;  %v62_v15 = vld [vmem:[%s898_s1 + $0x110] sm:$0xff]  ;;  %v48_v19 = vld [vmem:[%s898_s1 + $0xa0] sm:$0xff] }
   0x5   :  { %v63_v16 = vld [vmem:[%s898_s1 + $0x118] sm:$0xff]  ;;  %529 = vmatpush3.bf16.msra.mxu0 %v528_v8  ;;  %v532_v17 = vpack.c.bf16 %v31_v14, %v30_v12  ;;  %v49_v20 = vld [vmem:[%s898_s1 + $0xa8] sm:$0xff]  ;;  %v32_v21 = vld [vmem:[%s898_s1 + $0x20] sm:$0xff]  ;;  %v91_v46 = vsub.s32 %v88_v34, %v90_v35 }
   0x6   :  { %560 = vmatpush1.bf16.msra.mxu1 %v559_v9  ;;  %v562_v18 = vpack.c.bf16 %v63_v16, %v62_v15  ;;  %531 = vmatprep.subr.bf16.mxu0 %v530_v13  ;;  %v534_v25 = vpack.c.bf16 %v49_v20, %v48_v19  ;;  %v33_v26 = vld [vmem:[%s898_s1 + $0x28] sm:$0xff]  ;;  %v64_v27 = vld [vmem:[%s898_s1 + $0x120] sm:$0xff]  ;;  %v50_v29 = vld [vmem:[%s898_s1 + $0xb0] sm:$0xff] }
   0x7   :  { %561 = vmatprep.subr.bf16.mxu1 %v630_v5  ;;  %v65_v28 = vld [vmem:[%s898_s1 + $0x128] sm:$0xff]  ;;  %v51_v30 = vld [vmem:[%s898_s1 + $0xb8] sm:$0xff]  ;;  %v536_v31 = vpack.c.bf16 %v33_v26, %v32_v21  ;;  %v34_v33 = vld [vmem:[%s898_s1 + $0x30] sm:$0xff] }
   0x8   :  { %v565_v32 = vpack.c.bf16 %v65_v28, %v64_v27  ;;  %v538_v36 = vpack.c.bf16 %v51_v30, %v50_v29  ;;  %v35_v37 = vld [vmem:[%s898_s1 + $0x38] sm:$0xff]  ;;  %v66_v38 = vld [vmem:[%s898_s1 + $0x130] sm:$0xff]  ;;  %v52_v40 = vld [vmem:[%s898_s1 + $0xc0] sm:$0xff] }
   0x9   :  { %533 = vmatpush3.bf16.msra.mxu0 %v532_v17  ;;  %v67_v39 = vld [vmem:[%s898_s1 + $0x138] sm:$0xff]  ;;  %v53_v41 = vld [vmem:[%s898_s1 + $0xc8] sm:$0xff]  ;;  %v540_v42 = vpack.c.bf16 %v35_v37, %v34_v33  ;;  %v36_v44 = vld [vmem:[%s898_s1 + $0x40] sm:$0xff] }
   0xa   :  { %563 = vmatpush1.bf16.msra.mxu1 %v562_v18  ;;  %535 = vmatprep.subr.bf16.mxu0 %v534_v25  ;;  %v568_v43 = vpack.c.bf16 %v67_v39, %v66_v38  ;;  %v37_v45 = vld [vmem:[%s898_s1 + $0x48] sm:$0xff]  ;;  %v542_v47 = vpack.c.bf16 %v53_v41, %v52_v40  ;;  %v68_v48 = vld [vmem:[%s898_s1 + $0x140] sm:$0xff]  ;;  %v54_v50 = vld [vmem:[%s898_s1 + $0xd0] sm:$0xff] }
   0xb   :  { %564 = vmatprep.subr.bf16.mxu1 %v630_v5  ;;  %v69_v49 = vld [vmem:[%s898_s1 + $0x148] sm:$0xff]  ;;  %v55_v51 = vld [vmem:[%s898_s1 + $0xd8] sm:$0xff]  ;;  %v544_v52 = vpack.c.bf16 %v37_v45, %v36_v44  ;;  %v27_v53 = vld [vmem:[%s897_s0] sm:$0xff] }
   0xc   :  { %v571_v54 = vpack.c.bf16 %v69_v49, %v68_v48  ;;  %v38_v55 = vld [vmem:[%s898_s1 + $0x50] sm:$0xff]  ;;  %v85_v56 = vcombine.high %v27_v53, %v27_v53  ;;  %v92_v57 = vrot.slane %v27_v53, %v91_v46  ;;  %v546_v58 = vpack.c.bf16 %v55_v51, %v54_v50  ;;  %v39_v59 = vld [vmem:[%s898_s1 + $0x58] sm:$0xff]  ;;  %v56_v62 = vld [vmem:[%s898_s1 + $0xe0] sm:$0xff] }
   0xd   :  { %537 = vmatpush3.bf16.msra.mxu0 %v536_v31  ;;  %v70_v60 = vld [vmem:[%s898_s1 + $0x150] sm:$0xff]  ;;  %v71_v61 = vld [vmem:[%s898_s1 + $0x158] sm:$0xff]  ;;  %v57_v63 = vld [vmem:[%s898_s1 + $0xe8] sm:$0xff] }
   0xe   :  { %566 = vmatpush1.bf16.msra.mxu1 %v565_v32  ;;  %539 = vmatprep.subr.bf16.mxu0 %v538_v36  ;;  %v100_v0 = vcombine.high %v92_v57, %v92_v57  ;;  %v99_v1 = vrot.slane %v85_v56, %v91_v46 }
   0xf   :  { %567 = vmatprep.subr.bf16.mxu1 %v630_v5 }
  0x11   :  { %541 = vmatpush3.bf16.msra.mxu0 %v540_v42 }
  0x12   :  { %569 = vmatpush1.bf16.msra.mxu1 %v568_v43  ;;  %543 = vmatprep.subr.bf16.mxu0 %v542_v47 }
  0x13   :  { %570 = vmatprep.subr.bf16.mxu1 %v630_v5 }
  0x14   :  { %12 = vsyncpa [#allocation3], 0  ;;  %vm105_vm0 = vcmask 64512   ;;  %v548_v2 = vpack.c.bf16 %v39_v59, %v38_v55  ;;  %v574_v3 = vpack.c.bf16 %v71_v61, %v70_v60  ;;  %v40_v4 = vld [vmem:[%s898_s1 + $0x60] sm:$0xff]  ;;  %v101_v6 = vcombine.high %v99_v1, %v99_v1  ;;  %v41_v8 = vld [vmem:[%s898_s1 + $0x68] sm:$0xff]  ;;  %172 = vmatprep.mubr.f32.mxu0 %v100_v0  ;;  %s634_s10 = smov [#allocation2]  }
  0x15   :  { %545 = vmatpush3.bf16.msra.mxu0 %v544_v52  ;;  %v550_v7 = vpack.c.bf16 %v57_v63, %v56_v62  ;;  %v72_v9 = vld [vmem:[%s898_s1 + $0x160] sm:$0xff]  ;;  %v73_v10 = vld [vmem:[%s898_s1 + $0x168] sm:$0xff]  ;;  %v58_v11 = vld [vmem:[%s898_s1 + $0xf0] sm:$0xff]  ;;  %v552_v13 = vpack.c.bf16 %v41_v8, %v40_v4  ;;  %v632_v25 = vmov 0.0   ;;  %vm633_vm1 = vmmov 0   ;;  %s433_s11 = sshll.u32 %s634_s10, 4  ;;  %s434_s11 = int_to_ptr.vmem [resolvable:$true] %s433_s11 }
  0x16   :  { %572 = vmatpush1.bf16.msra.mxu1 %v571_v54  ;;  %547 = vmatprep.subr.bf16.mxu0 %v546_v58  ;;  %v59_v12 = vld [vmem:[%s898_s1 + $0xf8] sm:$0xff]  ;;  %v577_v14 = vpack.c.bf16 %v73_v10, %v72_v9  ;;  %v42_v15 = vld [vmem:[%s898_s1 + $0x70] sm:$0xff]  ;;  %v249_v22 = vld [vmem:[%s900_s3] sm:$0xff]  ;;  %vm264_vm2 = vcmask 523264   ;;  %vm350_vm3 = vcmask 261120   ;;  %vm425_vm4 = vcmask 9216   ;;  %p611_p1 = scmp.lt.s32.totalorder %s434_s11, %s434_s11 }
  0x17   :  { %573 = vmatprep.subr.bf16.mxu1 %v630_v5  ;;  %442 = vmatprep.mubr.msk.f32.mxu1 %vm105_vm0, %v101_v6  ;;  %v554_v16 = vpack.c.bf16 %v59_v12, %v58_v11  ;;  %v43_v17 = vld [vmem:[%s898_s1 + $0x78] sm:$0xff]  ;;  %v74_v18 = vld [vmem:[%s898_s1 + $0x170] sm:$0xff]  ;;  %v250_v23 = vld [vmem:[%s900_s3 + $0x8] sm:$0xff] }
  0x18   :  { %v75_v19 = vld [vmem:[%s898_s1 + $0x178] sm:$0xff]  ;;  %v556_v20 = vpack.c.bf16 %v43_v17, %v42_v15  ;;  %v583_v24 = vpack.c.bf16 %v250_v23, %v249_v22  ;;  %v76_v26 = vld [vmem:[%s898_s1 + $0x180] sm:$0xff]  ;;  %v251_v27 = vld [vmem:[%s900_s3 + $0x10] sm:$0xff] }
  0x19   :  { %549 = vmatpush3.bf16.msra.mxu0 %v548_v2  ;;  %v580_v21 = vpack.c.bf16 %v75_v19, %v74_v18  ;;  %v252_v28 = vld [vmem:[%s900_s3 + $0x18] sm:$0xff]  ;;  %v253_v30 = vld [vmem:[%s900_s3 + $0x20] sm:$0xff]  ;;  %v254_v31 = vld [vmem:[%s900_s3 + $0x28] sm:$0xff] }
  0x1a   :  { %575 = vmatpush1.bf16.msra.mxu1 %v574_v3  ;;  %551 = vmatprep.subr.bf16.mxu0 %v550_v7  ;;  %v586_v29 = vpack.c.bf16 %v252_v28, %v251_v27  ;;  %v589_v32 = vpack.c.bf16 %v254_v31, %v253_v30  ;;  %v255_v33 = vld [vmem:[%s900_s3 + $0x30] sm:$0xff]  ;;  %v256_v34 = vld [vmem:[%s900_s3 + $0x38] sm:$0xff]  ;;  %v339_v36 = vld [vmem:[%s902_s5] sm:$0xff] }
  0x1b   :  { %576 = vmatprep.subr.bf16.mxu1 %v630_v5  ;;  %v592_v35 = vpack.c.bf16 %v256_v34, %v255_v33  ;;  %v340_v37 = vld [vmem:[%s902_s5 + $0x8] sm:$0xff]  ;;  %v441_v41 = vld [vmem:[%s899_s2] ss:$0 sm:$0xff]  ;;  %v341_v48 = vld [vmem:[%s902_s5 + $0x10] sm:$0xff] }
  0x1c   :  { %v595_v38 = vpack.c.bf16 %v340_v37, %v339_v36  ;;  %v443_v50 = vld [vmem:[%s901_s4] ss:$0 sm:$0xff]  ;;  %s606_s4 = scalar_lea.vmem %s434_s11, 32 }
  0x1d   :  { %553 = vmatpush3.bf16.msra.mxu0 %v552_v13  ;;  %v445_v55 = vld [vmem:[%s903_s6] ss:$0 sm:$0xff]  ;;  %p607_p0 = scmp.ne.s32.totalorder %s434_s11, %s606_s4  ;;  %p612_p2 = scmp.lt.s32.totalorder %s606_s4, %s606_s4 }
  0x1e   :  { %578 = vmatpush1.bf16.msra.mxu1 %v577_v14  ;;  %555 = vmatprep.subr.bf16.mxu0 %v554_v16 }
  0x1f   :  { %579 = vmatprep.subr.bf16.mxu1 %v630_v5  ;;  %p613_p3 = por %p612_p2, %p611_p1 }
  0x21   :  { %557 = vmatpush3.bf16.msra.mxu0 %v556_v20  ;;  %p614_p4 = pnand %p613_p3, %p607_p0 }
  0x22   :  { %581 = vmatpush1.bf16.msra.mxu1 %v580_v21  ;;  %582 = vmatprep.subr.bf16.mxu0 %v630_v5 }
  0x23   :  { %210 = vmatprep.subr.mxu1 %v632_v25 }
  0x24   :  { %173 = vmatmul.mubr.f32.vlgmr.msra.gmra.mrb[0].mxu0 %v92_v57 }
  0x25   :  { %584 = vmatpush3.bf16.msra.mxu0 %v583_v24  ;;  %512 = vmatprep.mubr.msk.f32.mxu0 %vm633_vm1, %v632_v25 }
  0x26   :  { %211 = vmatpush1.msra.mxu1 %v76_v26  ;;  %585 = vmatprep.subr.bf16.mxu0 %v630_v5 }
  0x27   :  { %243 = vmatmul.mubr.f32.vlgmr.msra.gmra.mrb[0].mxu1 %v99_v1  ;;  %594 = vmatprep.subr.bf16.mxu1 %v630_v5 }
  0x28   :  { %523 = vmatprep.mubr.msk.f32.mxu1 %vm633_vm1, %v632_v25  ;;  %596 = vmatpush3.bf16.msra.mxu1 %v595_v38 }
  0x29   :  { %587 = vmatpush3.bf16.msra.mxu0 %v586_v29  ;;  %597 = vmatprep.subr.bf16.mxu1 %v630_v5 }
  0x2a   :  { %588 = vmatprep.subr.bf16.mxu0 %v630_v5 }
  0x2d   :  { %590 = vmatpush3.bf16.msra.mxu0 %v589_v32 }
  0x2e   :  { %591 = vmatprep.subr.bf16.mxu0 %v630_v5  ;;  %v342_v5 = vld [vmem:[%s902_s5 + $0x18] sm:$0xff] }
  0x2f   :  { %v598_v49 = vpack.c.bf16 %v342_v5, %v341_v48 }
  0x31   :  { %593 = vmatpush3.bf16.msra.mxu0 %v592_v35  ;;  %599 = vmatpush3.bf16.msra.mxu1 %v598_v49 }
  0xf7   :  { %v479_v39 = vpop.f32.mrb[0].mxu0 }
  0xf8   :  { %v480_v40 = vpop.f32.mrb[1].mxu0 }
  0xf9   :  { %v481_v42 = vadd.f32 %v480_v40, %v479_v39 }
  0xfa   :  { %v244_v43 = vpop.f32.mrb[0].mxu1 }
  0xfb   :  { %v246_v44 = vpop.f32.mrb[1].mxu1  ;;  %v175_v45 = vadd.f32 %v481_v42, %v441_v41 }
  0xfd   :  { %v245_v46 = vadd.f32 %v244_v43, %v175_v45 }
  0xff   :  { %v248_v47 = vmax.f32 %v245_v46, 0.0 }
 0x101   :  { %513 = vmatmul.mubr.msk.f32.vlgmr.msra.gmra.mrb[2].mxu0 %vm264_vm2, %v248_v47 }
 0x1d4   :  { %v334_v51 = vpop.f32.mrb[2].mxu0 }
 0x1d5   :  { %v335_v52 = vadd.f32 %v443_v50, %v334_v51  ;;  %v514_v53 = vpop.f32.mrb[3].mxu0 }
 0x1d7   :  { %v338_v54 = vmax.f32 %v335_v52, 0.0 }
 0x1d9   :  { %524 = vmatmul.mubr.msk.f32.vlgmr.msra.gmra.mrb[2].mxu1 %vm350_vm3, %v338_v54 }
 0x2ac   :  { %v420_v56 = vpop.f32.mrb[2].mxu1 }
 0x2ad   :  { %v421_v57 = vadd.f32 %v445_v55, %v420_v56  ;;  %v525_v58 = vpop.f32.mrb[3].mxu1 }
 0x2af   :  { %v424_v59 = vmax.f32 %v421_v57, 0.0 }
 0x2b1   :  { %426 = vst.msk [vmem:[#allocation2] sm:$0x3] %vm425_vm4, %v424_v59 }
 0x2b2   :  { %617 = shalt.err (!%p614_p4)
}
 0x2b3   :  { %s618_s6 = scalar_lea.hbm %s904_s7, 32 }
 0x2b4   :  { %p619_p5 = scmp.ne.s32.totalorder %s904_s7, %s618_s6  ;;  %p622_p6 = scmp.lt.u32.totalorder %s618_s6, %s904_s7 }
 0x2b6   :  { %p624_p7 = pnand %p622_p6, %p619_p5 }
 0x2b8   :  { %627 = shalt.err (!%p624_p7)
}
 0x2b9   :  { %436 = dma.vmem_to_hbm [thread:$0]  %s434_s11, 32, %s904_s7, [#allocation3]  }
 0x2ba   :  { %628 = dma.done.wait [#allocation3], 32  }
 0x2bb   :  { %629 = vsyncadd [#allocation3], 4294967264 }
 0x2bc   :  { %440 = vsyncpa [#allocation3], 1 }

</bundles_post_ra>
